<compile_context>
chip_gen: v5e
topology: v5e:2x2
jax: 0.10.0
libtpu: 0.0.40
codegen_flags: <defaults>
</compile_context>

<pallas_src>
import jax
import jax.numpy as jnp
from jax import lax
from jax.experimental import pallas as pl
from jax.experimental.pallas import tpu as pltpu

NEG_RATIO = 3.0
EPS = 1e-6
LANE = 128
MAX_TILE_ROWS = 2048          # ~1 MiB f32 tile; fine on v5e/v6e/v7x VMEM budgets
TOPK_BISECT_ITERS = 26        # resolution 100 / 2^26 ~ 1.5e-6 (VMEM-resident, cheap)


def _round_up(x, m):
    return ((x + m - 1) // m) * m


# ---------------------------------------------------------------------------
# Pass 1: streaming BCE + per-tile partial statistics (optionally loss map).
# ---------------------------------------------------------------------------
def _make_bce_stats_kernel(rows_total, tile_rows, need_row_mask, with_loss_map):
    def kernel(pred_ref, gt_ref, mask_ref, *out_refs):
        if with_loss_map:
            loss_ref, part_ref = out_refs
        else:
            (part_ref,) = out_refs

        pred = pred_ref[...].astype(jnp.float32)
        gt = gt_ref[...].astype(jnp.float32)
        m = mask_ref[...].astype(jnp.float32)

        if need_row_mask:
            # The last tile may extend past the logical end of the slab; its
            # contents are unspecified, so sanitise before any log / sum.
            row = (lax.broadcasted_iota(jnp.int32, (tile_rows, LANE), 0)
                   + pl.program_id(0) * tile_rows)
            valid = row < rows_total
            pred = jnp.where(valid, pred, 0.5)
            gt = jnp.where(valid, gt, 0.0)
            m = jnp.where(valid, m, 0.0)

        one_minus_gt = 1.0 - gt
        # .byte() truncation semantics of the PyTorch module.
        pos = jnp.floor(gt * m)
        neg = jnp.floor(one_minus_gt * m)

        # Full BCE with the same -100 log clamp as F.binary_cross_entropy
        # (valid for soft labels too; both logs go to the EUP slot).
        log_p = jnp.maximum(jnp.log(pred), -100.0)
        log_1p = jnp.maximum(jnp.log(1.0 - pred), -100.0)
        loss = -(gt * log_p + one_minus_gt * log_1p)

        if with_loss_map:
            loss_ref[...] = loss

        neg_loss = loss * neg
        # One lane-dense (4, 128) store of the per-lane partial statistics.
        stats = jnp.concatenate(
            [jnp.sum(loss * pos, axis=0, keepdims=True),
             jnp.sum(pos, axis=0, keepdims=True),
             jnp.sum(neg, axis=0, keepdims=True),
             jnp.sum(neg_loss, axis=0, keepdims=True)],
            axis=0)
        part_ref[0] = stats

    return kernel


# ---------------------------------------------------------------------------
# Pass 2: VMEM-resident top-k(negative_count) sum via threshold bisection.
# ---------------------------------------------------------------------------
def _make_topk_kernel(n_iters):
    def kernel(k_ref, pred_ref, gt_ref, mask_ref, out_ref, nl_ref):
        # Recompute neg_loss once into VMEM scratch (identical math to pass 1).
        pred = pred_ref[...].astype(jnp.float32)
        gt = gt_ref[...].astype(jnp.float32)
        m = mask_ref[...].astype(jnp.float32)
        one_minus_gt = 1.0 - gt
        neg = jnp.floor(one_minus_gt * m)
        log_p = jnp.maximum(jnp.log(pred), -100.0)
        log_1p = jnp.maximum(jnp.log(1.0 - pred), -100.0)
        loss = -(gt * log_p + one_minus_gt * log_1p)
        nl_ref[...] = loss * neg

        k = k_ref[0].astype(jnp.float32)

        # TODO(synk): torch.topk with a data-dependent k has no direct Pallas
        # equivalent; it is realised as a threshold bisection over the
        # VMEM-resident neg-loss copy plus an exact tie correction.
        def body(_, lo_hi):
            lo, hi = lo_hi
            mid = 0.5 * (lo + hi)
            cnt = jnp.sum((nl_ref[...] > mid).astype(jnp.float32))
            above = cnt > k
            return jnp.where(above, mid, lo), jnp.where(above, hi, mid)

        lo0 = jnp.zeros((), jnp.float32)
        hi0 = jnp.full((), 100.0, jnp.float32)   # BCE loss is clamped at 100
        _, thresh = lax.fori_loop(0, n_iters, body, (lo0, hi0))

        nl = nl_ref[...]
        over = nl > thresh
        cnt_over = jnp.sum(over.astype(jnp.float32))
        sum_over = jnp.sum(jnp.where(over, nl, 0.0))
        topk = sum_over + jnp.maximum(k - cnt_over, 0.0) * thresh
        out_ref[...] = jnp.broadcast_to(topk, (8, LANE))

    return kernel


# ---------------------------------------------------------------------------
# Wrapper
# ---------------------------------------------------------------------------
def _to_slab(x, rows, fill):
    total = x.size
    flat = x.reshape(-1)
    padded = rows * LANE
    if padded != total:
        # TODO(synk): this pad is a full HBM copy; only hit when N*H*W is not a
        # multiple of 128 (the kernel otherwise consumes the reshaped view).
        flat = jnp.pad(flat, (0, padded - total), constant_values=fill)
    return flat.reshape(rows, LANE)


def balance_cross_entropy_loss(pred, gt, mask,
                               negative_ratio=NEG_RATIO, eps=EPS,
                               return_origin=False):
    n, c, h, w = pred.shape
    assert c == 1, "pred must be (N, 1, H, W)"
    total = n * h * w
    rows = -(-total // LANE)

    if rows <= MAX_TILE_ROWS:
        tile_rows, num_tiles = rows, 1
    else:
        num_tiles = -(-rows // MAX_TILE_ROWS)
        if num_tiles % 2:
            num_tiles += 1                      # even tile count balances v7x's 2 TCs
        tile_rows = _round_up(-(-rows // num_tiles), 8)
        num_tiles = -(-rows // tile_rows)
    need_row_mask = (tile_rows * num_tiles != rows)

    # Inputs are used in their native dtype (gt/mask may be uint8) and upcast
    # in-kernel; pred stays f32 for log precision.  Neutral padding values.
    pred2 = _to_slab(pred, rows, 0.5)
    gt2 = _to_slab(gt, rows, 0)
    mask2 = _to_slab(mask, rows, 0)

    tile_spec = pl.BlockSpec((tile_rows, LANE), lambda i: (i, 0))
    part_spec = pl.BlockSpec((1, 4, LANE), lambda i: (i, 0, 0))

    part_shape = jax.ShapeDtypeStruct((num_tiles, 4, LANE), jnp.float32)
    if return_origin:
        out_shape = (jax.ShapeDtypeStruct((rows, LANE), jnp.float32), part_shape)
        out_specs = (tile_spec, part_spec)
    else:
        out_shape = part_shape
        out_specs = part_spec

    outs = pl.pallas_call(
        _make_bce_stats_kernel(rows, tile_rows, need_row_mask, return_origin),
        grid=(num_tiles,),
        in_specs=[tile_spec, tile_spec, tile_spec],
        out_specs=out_specs,
        out_shape=out_shape,
        compiler_params=pltpu.CompilerParams(
            dimension_semantics=("parallel",)),
    )(pred2, gt2, mask2)

    if return_origin:
        loss_map, partials = outs
    else:
        partials = outs

    # Tiny cross-lane / cross-tile reductions over the partial statistics.
    pos_sum = jnp.sum(partials[:, 0, :])
    positive_count = jnp.sum(partials[:, 1, :].astype(jnp.int32))
    neg_total = jnp.sum(partials[:, 2, :].astype(jnp.int32))
    neg_loss_sum = jnp.sum(partials[:, 3, :])

    cap = jnp.floor(positive_count.astype(jnp.float32)
                    * negative_ratio).astype(jnp.int32)
    negative_count = jnp.minimum(neg_total, cap)
    k = negative_count

    # --- dynamic-k top-k over negative losses ------------------------------
    # Exact fast paths (no extra HBM pass): k == 0 and k == #negatives.
    needs_refine = jnp.logical_and(k > 0, k < neg_total)

    vmem_needed = rows * LANE * (pred2.dtype.itemsize + gt2.dtype.itemsize
                                 + mask2.dtype.itemsize + 4) + (1 << 20)
    # TODO(synk): maps whose neg-loss copy does not fit in VMEM need a tiled
    # (histogram-based) refinement; pass 2 currently keeps it VMEM-resident.
    topk_call = pl.pallas_call(
        _make_topk_kernel(TOPK_BISECT_ITERS),
        out_shape=jax.ShapeDtypeStruct((8, LANE), jnp.float32),
        in_specs=[pl.BlockSpec(memory_space=pltpu.MemorySpace.SMEM),
                  pl.BlockSpec(memory_space=pltpu.MemorySpace.VMEM),
                  pl.BlockSpec(memory_space=pltpu.MemorySpace.VMEM),
                  pl.BlockSpec(memory_space=pltpu.MemorySpace.VMEM)],
        out_specs=pl.BlockSpec(memory_space=pltpu.MemorySpace.VMEM),
        scratch_shapes=[pltpu.VMEM((rows, LANE), jnp.float32)],
        compiler_params=pltpu.CompilerParams(
            vmem_limit_bytes=int(max(vmem_needed, 32 * 1024 * 1024))),
    )

    def _refine(_):
        return topk_call(k.reshape(1), pred2, gt2, mask2)[0, 0]

    neg_topk_sum = lax.cond(needs_refine, _refine,
                            lambda _: jnp.zeros((), jnp.float32), 0)
    neg_topk_sum = jnp.where(k >= neg_total, neg_loss_sum, neg_topk_sum)

    denom = (positive_count + negative_count).astype(jnp.float32) + eps
    balance_loss = (pos_sum + neg_topk_sum) / denom

    if return_origin:
        loss_full = loss_map.reshape(-1)[:total].reshape(n, c, h, w)
        return balance_loss, loss_full
    return balance_loss


# ---------------------------------------------------------------------------
# Pure-JAX references (match the PyTorch module, sort-based top-k).
# ---------------------------------------------------------------------------
def _reference_loss_map(pred, gt):
    p = pred.astype(jnp.float32)
    g = gt.astype(jnp.float32)
    return -(g * jnp.maximum(jnp.log(p), -100.0)
             + (1.0 - g) * jnp.maximum(jnp.log(1.0 - p), -100.0))


def _reference(pred, gt, mask, negative_ratio=NEG_RATIO, eps=EPS):
    p = pred.reshape(-1).astype(jnp.float32)
    g = gt.reshape(-1).astype(jnp.float32)
    m = mask.reshape(-1).astype(jnp.float32)
    positive = jnp.floor(g * m)
    negative = jnp.floor((1.0 - g) * m)
    positive_count = jnp.floor(jnp.sum(positive))
    negative_count = jnp.minimum(jnp.floor(jnp.sum(negative)),
                                 jnp.floor(positive_count * negative_ratio))
    loss = -(g * jnp.maximum(jnp.log(p), -100.0)
             + (1.0 - g) * jnp.maximum(jnp.log(1.0 - p), -100.0))
    positive_loss = loss * positive
    negative_loss = loss * negative
    sorted_desc = jnp.sort(negative_loss)[::-1]
    idx = jnp.arange(negative_loss.shape[0], dtype=jnp.int32)
    neg_topk = jnp.sum(jnp.where(idx < negative_count, sorted_desc, 0.0))
    return (jnp.sum(positive_loss) + neg_topk) / (positive_count
                                                  + negative_count + eps)


if __name__ == "__main__":
    key = jax.random.PRNGKey(0)
    k1, k2, k3 = jax.random.split(key, 3)

    N, H, W = 2, 16, 16
    # pred in (0, 1) (sigmoid output, as BCE expects), f32 for log precision.
    pred = jax.nn.sigmoid(jax.random.normal(k1, (N, 1, H, W), jnp.float32))
    # gt / mask as uint8 binary maps -> narrow HBM reads.
    # Sparse positives -> k < #negatives, exercising the bisection pass.
    gt = (jax.random.uniform(k2, (N, 1, H, W)) > 0.88).astype(jnp.uint8)
    mask = (jax.random.uniform(k3, (N, H, W)) > 0.3).astype(jnp.uint8)

    loss = balance_cross_entropy_loss(pred, gt, mask)
    loss = jax.block_until_ready(loss)
    assert loss.shape == ()
    assert bool(jnp.isfinite(loss))
    ref = _reference(pred, gt, mask)
    assert bool(jnp.allclose(loss, ref, rtol=1e-4, atol=1e-5)), (loss, ref)

    # Dense positives -> k == #negatives: exact fast path, second pass skipped.
    gt_dense = (jax.random.uniform(k2, (N, 1, H, W)) > 0.5).astype(jnp.uint8)
    loss_d = jax.block_until_ready(
        balance_cross_entropy_loss(pred, gt_dense, mask))
    ref_d = _reference(pred, gt_dense, mask)
    assert bool(jnp.allclose(loss_d, ref_d, rtol=1e-4, atol=1e-5)), (loss_d, ref_d)

    # return_origin variant also emits the full BCE loss map.
    loss2, loss_map = balance_cross_entropy_loss(pred, gt, mask,
                                                 return_origin=True)
    jax.block_until_ready((loss2, loss_map))
    assert loss_map.shape == (N, 1, H, W)
    ref_map = _reference_loss_map(pred, gt)
    assert bool(jnp.allclose(loss2, ref, rtol=1e-4, atol=1e-5)), (loss2, ref)
    assert bool(jnp.allclose(loss_map, ref_map, rtol=1e-4, atol=1e-5))

    print("KERNEL_OK")
</pallas_src>

<mosaic_0001>
module attributes {stable_mosaic.version = 11 : i64} {
  func.func @kernel(%arg0: i32, %arg1: memref<4x128xf32, #tpu.memory_space<vmem>>, %arg2: memref<4x128xi8, #tpu.memory_space<vmem>>, %arg3: memref<4x128xi8, #tpu.memory_space<vmem>>, %arg4: memref<1x4x128xf32, #tpu.memory_space<vmem>>) attributes {dimension_semantics = [#tpu.dimension_semantics<parallel>], iteration_bounds = array<i64: 1>, scalar_prefetch = 0 : i64, scratch_operands = 0 : i64, tpu.core_type = #tpu.core_type<tc>, window_params = [{transform_indices = @transform_0, window_bounds = array<i64: 4, 128>}, {transform_indices = @transform_1, window_bounds = array<i64: 4, 128>}, {transform_indices = @transform_2, window_bounds = array<i64: 4, 128>}, {transform_indices = @transform_3, window_bounds = array<i64: 1, 4, 128>}]} {
    %c0 = arith.constant 0 : index
    %c0_0 = arith.constant 0 : index
    %0 = vector.load %arg1[%c0, %c0_0] : memref<4x128xf32, #tpu.memory_space<vmem>>, vector<4x128xf32>
    %c0_1 = arith.constant 0 : index
    %c0_2 = arith.constant 0 : index
    %1 = vector.load %arg2[%c0_1, %c0_2] : memref<4x128xi8, #tpu.memory_space<vmem>>, vector<4x128xi8>
    %2 = arith.uitofp %1 : vector<4x128xi8> to vector<4x128xf32>
    %c0_3 = arith.constant 0 : index
    %c0_4 = arith.constant 0 : index
    %3 = vector.load %arg3[%c0_3, %c0_4] : memref<4x128xi8, #tpu.memory_space<vmem>>, vector<4x128xi8>
    %4 = arith.uitofp %3 : vector<4x128xi8> to vector<4x128xf32>
    %cst = arith.constant 1.000000e+00 : f32
    %5 = vector.broadcast %cst : f32 to vector<4x128xf32>
    %6 = arith.subf %5, %2 : vector<4x128xf32>
    %7 = arith.mulf %2, %4 : vector<4x128xf32>
    %8 = math.floor %7 : vector<4x128xf32>
    %9 = arith.mulf %6, %4 : vector<4x128xf32>
    %10 = math.floor %9 : vector<4x128xf32>
    %11 = math.log %0 : vector<4x128xf32>
    %cst_5 = arith.constant -1.000000e+02 : f32
    %12 = vector.broadcast %cst_5 : f32 to vector<4x128xf32>
    %13 = arith.maximumf %11, %12 : vector<4x128xf32>
    %cst_6 = arith.constant 1.000000e+00 : f32
    %14 = vector.broadcast %cst_6 : f32 to vector<4x128xf32>
    %15 = arith.subf %14, %0 : vector<4x128xf32>
    %16 = math.log %15 : vector<4x128xf32>
    %cst_7 = arith.constant -1.000000e+02 : f32
    %17 = vector.broadcast %cst_7 : f32 to vector<4x128xf32>
    %18 = arith.maximumf %16, %17 : vector<4x128xf32>
    %19 = arith.mulf %2, %13 : vector<4x128xf32>
    %20 = arith.mulf %6, %18 : vector<4x128xf32>
    %21 = arith.addf %19, %20 : vector<4x128xf32>
    %cst_8 = arith.constant 0.000000e+00 : f32
    %22 = vector.broadcast %cst_8 : f32 to vector<4x128xf32>
    %23 = arith.subf %22, %21 : vector<4x128xf32>
    %24 = arith.mulf %23, %10 : vector<4x128xf32>
    %25 = arith.mulf %23, %8 : vector<4x128xf32>
    %cst_9 = arith.constant dense<0.000000e+00> : vector<128xf32>
    %26 = vector.multi_reduction <add>, %25, %cst_9 [0] : vector<4x128xf32> to vector<128xf32>
    %27 = vector.shape_cast %26 : vector<128xf32> to vector<1x128xf32>
    %cst_10 = arith.constant dense<0.000000e+00> : vector<128xf32>
    %28 = vector.multi_reduction <add>, %8, %cst_10 [0] : vector<4x128xf32> to vector<128xf32>
    %29 = vector.shape_cast %28 : vector<128xf32> to vector<1x128xf32>
    %cst_11 = arith.constant dense<0.000000e+00> : vector<128xf32>
    %30 = vector.multi_reduction <add>, %10, %cst_11 [0] : vector<4x128xf32> to vector<128xf32>
    %31 = vector.shape_cast %30 : vector<128xf32> to vector<1x128xf32>
    %cst_12 = arith.constant dense<0.000000e+00> : vector<128xf32>
    %32 = vector.multi_reduction <add>, %24, %cst_12 [0] : vector<4x128xf32> to vector<128xf32>
    %33 = vector.shape_cast %32 : vector<128xf32> to vector<1x128xf32>
    %34 = tpu.concatenate %27, %29, %31, %33 in 0 : vector<1x128xf32>, vector<1x128xf32>, vector<1x128xf32>, vector<1x128xf32> -> vector<4x128xf32>
    %c0_13 = arith.constant 0 : index
    %c0_14 = arith.constant 0 : index
    %c0_15 = arith.constant 0 : index
    %35 = vector.load %arg4[%c0_13, %c0_14, %c0_15] : memref<1x4x128xf32, #tpu.memory_space<vmem>>, vector<1x4x128xf32>
    %36 = vector.shape_cast %35 : vector<1x4x128xf32> to vector<4x128xf32>
    %37 = vector.shape_cast %34 : vector<4x128xf32> to vector<1x4x128xf32>
    tpu.vector_store %arg4[%c0_13, %c0_14, %c0_15], %37 {strides = array<i32>} : memref<1x4x128xf32, #tpu.memory_space<vmem>>, vector<1x4x128xf32>,
    return
  }
  func.func @transform_0(%arg0: i32) -> (i32, i32) {
    %c0_i32 = arith.constant 0 : i32
    %c0_i32_0 = arith.constant 0 : i32
    return %arg0, %c0_i32 : i32, i32
  }
  func.func @transform_1(%arg0: i32) -> (i32, i32) {
    %c0_i32 = arith.constant 0 : i32
    %c0_i32_0 = arith.constant 0 : i32
    return %arg0, %c0_i32 : i32, i32
  }
  func.func @transform_2(%arg0: i32) -> (i32, i32) {
    %c0_i32 = arith.constant 0 : i32
    %c0_i32_0 = arith.constant 0 : i32
    return %arg0, %c0_i32 : i32, i32
  }
  func.func @transform_3(%arg0: i32) -> (i32, i32, i32) {
    %c0_i32 = arith.constant 0 : i32
    %c0_i32_0 = arith.constant 0 : i32
    %c0_i32_1 = arith.constant 0 : i32
    return %arg0, %c0_i32, %c0_i32_0 : i32, i32, i32
  }
}

</mosaic_0001>

<bundles_post_ra>
// kernel: tpu_custom_call.1
= control target key start
LH: loop header
LB: loop body
LE: loop exit
PB: predicated region body
PF: predicated region fallthrough
CT: control target
= control target key end

     0   :  { %8 = vsyncpa [#allocation3], 0  ;;  %s248_s0 = inlined_call_operand.hbm [shape: f32[4,128], index: 0, kind: input, shape index: {}]   ;;  %s249_s1 = inlined_call_operand.hbm [shape: u8[4,128], index: 1, kind: input, shape index: {}]   ;;  %s250_s2 = inlined_call_operand.vmem [shape: u8[4,128], index: 2, kind: input, shape index: {}]   ;;  %s251_s3 = inlined_call_operand.hbm [shape: f32[1,4,128], index: 3, kind: output, shape index: {}]  }
   0x1   :  { %9 = vsyncpa [#allocation6], 0 }
   0x2   :  { %10 = vsyncpa [#allocation4], 0  ;;  %s16_s14 = sshll.u32 %s248_s0, 4  ;;  %s209_s15 = smov [#allocation2]   ;;  %s17_s14 = int_to_ptr.hbm [resolvable:$true] %s16_s14 }
   0x3   :  { %s18_s16 = sshll.u32 %s209_s15, 4  ;;  %s27_s19 = sshll.u32 %s249_s1, 4  ;;  %s19_s16 = int_to_ptr.vmem [resolvable:$true] %s18_s16  ;;  %s28_s19 = int_to_ptr.hbm [resolvable:$true] %s27_s19 }
   0x4   :  { %21 = dma.hbm_to_vmem [thread:$0]  %s17_s14, 64, %s19_s16, [#allocation3]  }
   0x5   :  { %s210_s20 = smov [#allocation5]  }
   0x6   :  { %s29_s21 = sshll.u32 %s210_s20, 4  ;;  %s30_s21 = int_to_ptr.vmem [resolvable:$true] %s29_s21 }
   0x7   :  { %32 = dma.hbm_to_vmem [thread:$0]  %s28_s19, 16, %s30_s21, [#allocation6]  }
   0x8   :  { %203 = dma.done.wait [#allocation3], 64  }
   0x9   :  { %204 = vsyncadd [#allocation3], 4294967232 }
   0xa   :  { %205 = dma.done.wait [#allocation6], 16  }
   0xb   :  { %206 = vsyncadd [#allocation6], 4294967280  ;;  %v43_v0 = vld [vmem:[#allocation2] sm:$0xf]  ;;  %v44_v1 = vld [vmem:[#allocation5] sm:$0x1] }
   0xc   :  { %v48_v2 = vld [vmem:[%s250_s2] sm:$0x1]  ;;  %v45_v3 = vunpack.c.0.s8 %v44_v1  ;;  %127 = vlog2.f32 %v43_v0  ;;  %v60_v5 = vsub.f32 1.0, %v43_v0  ;;  %vm70_vm0 = vcmask 1043456   ;;  %s211_s1 = smov [#allocation7]   ;;  %s113_s25 = sshll.u32 %s251_s3, 4  ;;  %s114_s25 = int_to_ptr.hbm [resolvable:$true] %s113_s25 }
   0xd   :  { %v49_v4 = vunpack.c.0.s8 %v48_v2  ;;  %vm99_vm1 = vcmask 1040384   ;;  %vm101_vm2 = vcmask 1041408   ;;  %s111_s2 = sshll.u32 %s211_s1, 4  ;;  %vm103_vm3 = vcmask 1042432   ;;  %s112_s2 = int_to_ptr.vmem [resolvable:$true] %s111_s2 }
   0xe   :  { %v46_v6 = vand.u32 255, %v45_v3  ;;  %129 = vlog2.f32 %v60_v5 }
   0xf   :  { %v50_v7 = vand.u32 255, %v49_v4 }
  0x10   :  { %v47_v8 = vcvt.s32.f32 %v46_v6 }
  0x11   :  { %v51_v9 = vcvt.s32.f32 %v50_v7 }
  0x12   :  { %v128_v10 = vpop.eup %127  ;;  %v52_v11 = vsub.f32 1.0, %v47_v8 }
  0x13   :  { %v53_v12 = vmul.f32 %v51_v9, %v47_v8  ;;  %v58_v13 = vmul.f32 0.6931472, %v128_v10 }
  0x14   :  { %v130_v14 = vpop.eup %129  ;;  %v55_v16 = vmul.f32 %v52_v11, %v51_v9 }
  0x15   :  { %v54_v15 = vfloor.f32 %v53_v12  ;;  %v59_v17 = vmax.f32 %v58_v13, -100.0  ;;  %v62_v18 = vmul.f32 0.6931472, %v130_v14 }
  0x16   :  { %v56_v19 = vfloor.f32 %v55_v16 }
  0x17   :  { %v78_v20 = vsel %vm70_vm0, %v54_v15, 0.0  ;;  %v63_v21 = vmax.f32 %v62_v18, -100.0  ;;  %v64_v22 = vmul.f32 %v59_v17, %v47_v8 }
  0x18   :  { %v79_v23 = vrot.slane %v78_v20, 4  ;;  %v85_v24 = vsel %vm70_vm0, %v56_v19, 0.0 }
  0x19   :  { %v65_v25 = vmul.f32 %v63_v21, %v52_v11  ;;  %v86_v26 = vrot.slane %v85_v24, 4 }
  0x1a   :  { %v80_v27 = vadd.f32 %v79_v23, %v78_v20 }
  0x1b   :  { %v66_v28 = vadd.f32 %v65_v25, %v64_v22  ;;  %v87_v29 = vadd.f32 %v86_v26, %v85_v24 }
  0x1c   :  { %v81_v31 = vrot.slane %v80_v27, 2 }
  0x1d   :  { %v67_v30 = vsub.f32 0.0, %v66_v28  ;;  %v88_v34 = vrot.slane %v87_v29, 2 }
  0x1e   :  { %v82_v38 = vadd.f32 %v81_v31, %v80_v27 }
  0x1f   :  { %v68_v32 = vmul.f32 %v67_v30, %v56_v19  ;;  %v69_v33 = vmul.f32 %v67_v30, %v54_v15  ;;  %v89_v40 = vadd.f32 %v88_v34, %v87_v29 }
  0x20   :  { %v83_v44 = vrot.slane %v82_v38, 1 }
  0x21   :  { %v71_v35 = vsel %vm70_vm0, %v69_v33, 0.0  ;;  %v92_v36 = vsel %vm70_vm0, %v68_v32, 0.0  ;;  %v90_v46 = vrot.slane %v89_v40, 1 }
  0x22   :  { %v72_v37 = vrot.slane %v71_v35, 4  ;;  %v93_v39 = vrot.slane %v92_v36, 4  ;;  %v84_v50 = vadd.f32 %v83_v44, %v82_v38 }
  0x23   :  { %v91_v52 = vadd.f32 %v90_v46, %v89_v40 }
  0x24   :  { %v73_v41 = vadd.f32 %v72_v37, %v71_v35  ;;  %v94_v42 = vadd.f32 %v93_v39, %v92_v36 }
  0x26   :  { %v74_v43 = vrot.slane %v73_v41, 2  ;;  %v95_v45 = vrot.slane %v94_v42, 2 }
  0x28   :  { %v75_v47 = vadd.f32 %v74_v43, %v73_v41  ;;  %v96_v48 = vadd.f32 %v95_v45, %v94_v42 }
  0x2a   :  { %v76_v49 = vrot.slane %v75_v47, 1  ;;  %v97_v51 = vrot.slane %v96_v48, 1 }
  0x2c   :  { %v77_v53 = vadd.f32 %v76_v49, %v75_v47  ;;  %v98_v54 = vadd.f32 %v97_v51, %v96_v48 }
  0x2e   :  { %v100_v55 = vsel %vm99_vm1, %v77_v53, %v84_v50 }
  0x2f   :  { %v102_v56 = vsel %vm101_vm2, %v100_v55, %v91_v52 }
  0x30   :  { %v104_v57 = vsel %vm103_vm3, %v102_v56, %v98_v54 }
  0x31   :  { %105 = vst [vmem:[#allocation7] sm:$0xf] %v104_v57 }
  0x32   :  { %116 = dma.vmem_to_hbm [thread:$0]  %s112_s2, 64, %s114_s25, [#allocation4]  }
  0x33   :  { %207 = dma.done.wait [#allocation4], 64  }
  0x34   :  { %208 = vsyncadd [#allocation4], 4294967232 }
  0x35   :  { %121 = vsyncpa [#allocation3], 1 }
  0x36   :  { %122 = vsyncpa [#allocation6], 1 }
  0x37   :  { %123 = vsyncpa [#allocation4], 1 }

</bundles_post_ra>
